<compile_context>
chip_gen: v7x
topology: tpu7x:2x2x1
jax: 0.10.0
libtpu: 0.0.40
codegen_flags: <defaults>
</compile_context>

<pallas_src>
import jax
import jax.numpy as jnp
from jax.experimental import pallas as pl
from jax.experimental.pallas import tpu as pltpu


def _reference_forward(x, w1, wa, bias, running_mean, running_var, *,
                       subsampling_factor, bypass_scale, cnn_padding, eps=1e-5):
    """Plain-JAX/XLA reference replicating the PyTorch module (inference mode)."""
    K = w1.shape[-1]
    s, p = int(subsampling_factor), int(cnn_padding)
    dn = ("NCH", "OIH", "NCH")
    y = jax.lax.conv_general_dilated(x, w1, (1,), "VALID", dimension_numbers=dn)
    z = jax.lax.conv_general_dilated(y, wa, (s,), [(p, p)], dimension_numbers=dn)
    z = z + bias[None, :, None]
    r = jnp.maximum(z, 0.0)
    bn = (r - running_mean[None, :, None]) * jax.lax.rsqrt(
        running_var + eps)[None, :, None]
    if K > 1:
        return bypass_scale * x + bn
    return bypass_scale * x[:, :, ::s] + bn


def _make_tdnnf_kernel(K, p, TT, T2, C_b, bypass_scale):
    """Fused TDNN-F forward for one (batch, time-tile) grid cell."""

    def kernel(x_ref, halo_ref, w1_ref, wa_ref, bh_ref, o_ref):
        # x_ref    : (1, C_in, TT)       f32  input frames [t0, t0 + TT)
        # halo_ref : (1, 1, C_in, K-1)   f32  [p left | K-1-p right] context frames
        # w1_ref   : (K*C_b, C_in)       bf16 row block k = tap-k bottleneck weight
        # wa_ref   : (C_out, C_b)        bf16 1x1 affine conv, BN scale folded in
        # bh_ref   : (C_out, 2)          f32  col0 = bias*g, col1 = -mean*g
        # o_ref    : (1, C_out, TT)      output dtype (f32 or bf16)
        t0 = pl.program_id(1) * TT
        x_f32 = x_ref[0]                                   # kept f32 for bypass
        x_bf = x_f32.astype(jnp.bfloat16)                  # MXU operand only
        halo_bf = halo_ref[0, 0].astype(jnp.bfloat16)      # (C_in, K-1)

        # Per-tap bottleneck projections (one deep-contraction MXU matmul for
        # the main tile, one tiny one for the K-1 halo frames):
        #   U[k*C_b + cb, j] = (W_k @ x)[cb, t0 + j]
        #   H[k*C_b + cb, m] = (W_k @ x)[cb, halo frame m]
        U = jnp.dot(w1_ref[...], x_bf, preferred_element_type=jnp.float32)
        H = jnp.dot(w1_ref[...], halo_bf, preferred_element_type=jnp.float32)

        # y[cb, t] = sum_k (W_k @ x)[cb, t + k - p]: rotate each tap's (C_b, TT)
        # output by (p - k) lanes on the XLU and sum; the <=|k-p| wrapped edge
        # columns are patched from the halo projection.  Shifting the conv
        # OUTPUT (C_b wide) instead of building a (K*C_in, TT) im2col slab moves
        # ~C_in/C_b x less data and frees several MB of VMEM per tile.
        col = jax.lax.broadcasted_iota(jnp.int32, (1, TT), 1)
        yp = None
        for k in range(K):
            Uk = U[k * C_b:(k + 1) * C_b, :]
            d = k - p
            if d == 0:
                Sk = Uk
            else:
                Sk = pltpu.roll(Uk, shift=(-d) % TT, axis=1)
                if d < 0:       # leading columns wrapped -> left-context frames
                    for j in range(-d):
                        Sk = jnp.where(col == j,
                                       H[k * C_b:(k + 1) * C_b, j + k:j + k + 1],
                                       Sk)
                else:           # trailing columns wrapped -> right-context frames
                    for j in range(TT - d, TT):
                        m = p + j + d - TT
                        Sk = jnp.where(col == j,
                                       H[k * C_b:(k + 1) * C_b, m:m + 1],
                                       Sk)
            yp = Sk if yp is None else yp + Sk

        # The 1x1 affine conv zero-pads the bottleneck sequence by p frames per
        # side: zero the columns whose bottleneck frame (t - p) is out of range.
        # Only the first/last tiles are affected, but the select acts on the
        # small (C_b, TT) tensor (~C_b*TT/1024 VALU ops per tile), cheaper than
        # round-tripping yp through a VMEM scratch just to pl.when-gate it.
        t = t0 + col
        yp = jnp.where((t >= p) & (t < T2 - p), yp, 0.0)

        # affine 1x1 (+bias) -> ReLU -> BatchNorm shift.  BN scale
        # g = rsqrt(var+eps) is pre-folded into wa/bias; pulling it through the
        # ReLU is valid only because g > 0 (var + eps > 0).
        z = jnp.dot(wa_ref[...], yp.astype(jnp.bfloat16),
                    preferred_element_type=jnp.float32) + bh_ref[:, 0:1]
        bn = jnp.maximum(z, 0.0) + bh_ref[:, 1:2]

        # Residual bypass in exact f32: output frame t aligns with input frame t
        # (s == 1 and 2p == K-1).
        o_ref[0] = (bn + bypass_scale * x_f32.astype(jnp.float32)
                    ).astype(o_ref.dtype)

    return kernel


def factorized_tdnn_forward(x, w1, wa, bias, running_mean, running_var, *,
                            subsampling_factor=1, bypass_scale=0.66,
                            cnn_padding=1, eps=1e-5, time_tile=1024,
                            out_dtype=None):
    """Inference forward of FactorizedTDNN.  x: (N, dim, T), NCW.

    w1   : (bottleneck, dim, K)   factorized ('linear') conv weight
    wa   : (dim, bottleneck, 1)   'affine' 1x1 conv weight
    bias : (dim,)                 'affine' conv bias
    running_mean/var : (dim,)     BatchNorm1d running statistics (affine=False)

    time_tile: frames per kernel invocation (multiple of 128).  1024 is a good
    default on v5e/v6e (128 MiB VMEM) and fits v7x's 64 MiB now that no im2col
    slab is built; drop to 512 for dim >= ~2048 on v7x.
    out_dtype: output dtype (default x.dtype).  bf16 halves the writeback HBM
    traffic, worthwhile on the mem-bound v5e/v6e roofline if the caller accepts it.
    """
    # TODO(synk): training-mode BatchNorm (batch statistics), SharedDimScaleDropout
    # with alpha>0, and constrain_orthonormal() (training-time weight projection)
    # are not implemented (inference forward only).
    N, C_in, T = x.shape
    C_b, C_in_w, K = w1.shape
    C_out, C_b2, kw = wa.shape
    assert C_in_w == C_in and C_b2 == C_b and kw == 1 and C_out == C_in
    s, p = int(subsampling_factor), int(cnn_padding)
    out_dtype = x.dtype if out_dtype is None else jnp.dtype(out_dtype)

    if K == 1:
        # TODO(synk): kernel_size==1 (stride-s subsampling) branch is served by
        # the plain-JAX path; only the K>1 residual branch is ported to Pallas.
        return _reference_forward(
            x, w1, wa, bias, running_mean, running_var,
            subsampling_factor=s, bypass_scale=bypass_scale,
            cnn_padding=p, eps=eps).astype(out_dtype)

    assert s == 1, "K>1 residual branch requires subsampling_factor == 1"
    T1 = T - K + 1
    T2 = T1 + 2 * p
    assert T2 == T, "residual bypass requires 2*cnn_padding == kernel_size - 1"

    # ---- parameter folding (tiny, done once per call in plain JAX) ----------
    f32 = jnp.float32
    g = jax.lax.rsqrt(running_var.astype(f32) + eps)                  # (C_out,) > 0
    wa_f = (wa[:, :, 0].astype(f32) * g[:, None]).astype(jnp.bfloat16)
    bh = jnp.stack([bias.astype(f32) * g,                             # affine bias*g
                    -running_mean.astype(f32) * g], axis=1)           # BN shift
    # Per-tap bottleneck weights stacked along rows: row k*C_b + cb <- w1[cb, :, k]
    w1_f = jnp.transpose(w1, (2, 0, 1)).reshape(K * C_b, C_in).astype(jnp.bfloat16)

    # ---- time tiling ---------------------------------------------------------
    if T2 <= time_tile:
        TT = max(128, -(-T2 // 128) * 128)   # single lane-dense (128-mult) tile
    else:
        assert time_tile % 128 == 0 and time_tile >= 128, \
            "time_tile must be a multiple of 128"
        TT = time_tile
    grid_t = pl.cdiv(T2, TT)
    T2p = grid_t * TT

    # NOTE: the pad / final slice are full copies of x / out; they only run when
    # T is not a multiple of the tile.  Padded tail columns produce junk that is
    # sliced off below -- do not remove the slice.
    x_in = x if T2p == T else jnp.pad(x, ((0, 0), (0, 0), (0, T2p - T)))

    # Per-tile halo frames (p left, K-1-p right), zeroed outside [0, T).
    # Tiny: grid_t * (K - 1) frames total.
    Km1 = K - 1
    t0s = jnp.arange(grid_t) * TT
    idx = jnp.concatenate(
        [t0s[:, None] + jnp.arange(-p, 0)[None, :],
         t0s[:, None] + TT + jnp.arange(0, Km1 - p)[None, :]],
        axis=1)                                                      # (grid_t, K-1)
    ok = (idx >= 0) & (idx < T)
    gathered = x_in[:, :, jnp.clip(idx, 0, T2p - 1)]                 # (N, C_in, grid_t, K-1)
    halos = jnp.where(ok[None, None], gathered, 0).transpose(0, 2, 1, 3)

    kernel = _make_tdnnf_kernel(K, p, TT, T2, C_b, float(bypass_scale))

    in_item = jnp.dtype(x.dtype).itemsize
    out_item = jnp.dtype(out_dtype).itemsize
    flops = (2 * N * grid_t * K * C_b * C_in * (TT + Km1)    # bottleneck taps
             + 2 * N * T2p * C_out * C_b)                    # 1x1 affine
    bytes_accessed = (x_in.size * in_item + halos.size * in_item
                      + (w1_f.size + wa_f.size) * 2 + bh.size * 4
                      + N * C_out * T2p * out_item)

    def _const_spec(shape):
        """Grid-invariant operand: single-buffer it (no pipelining benefit)."""
        idx_map = lambda b, t: (0, 0)
        try:
            return pl.BlockSpec(shape, idx_map, pipeline_mode=pl.Buffered(1))
        except Exception:                     # pipeline_mode unsupported: default
            return pl.BlockSpec(shape, idx_map)

    out = pl.pallas_call(
        kernel,
        out_shape=jax.ShapeDtypeStruct((N, C_out, T2p), out_dtype),
        grid=(N, grid_t),
        in_specs=[
            pl.BlockSpec((1, C_in, TT), lambda b, t: (b, 0, t)),
            pl.BlockSpec((1, 1, C_in, Km1), lambda b, t: (b, t, 0, 0)),
            _const_spec((K * C_b, C_in)),
            _const_spec((C_out, C_b)),
            _const_spec((C_out, 2)),
        ],
        out_specs=pl.BlockSpec((1, C_out, TT), lambda b, t: (b, 0, t)),
        compiler_params=pltpu.CompilerParams(
            # time axis stays "parallel": on v7x (2 TCs/chip) it is what lets
            # small-batch workloads use both TensorCores.
            dimension_semantics=("parallel", "parallel"),
            vmem_limit_bytes=48 * 1024 * 1024),
        cost_estimate=pl.CostEstimate(
            flops=flops, transcendentals=0, bytes_accessed=bytes_accessed),
    )(x_in, halos, w1_f, wa_f, bh)

    return out if T2p == T2 else out[:, :, :T2]


if __name__ == "__main__":
    # Small shapes consistent with the module (canonical tdnnf config).
    dim, bottleneck_dim, kernel_size = 32, 16, 3
    subsampling_factor, bypass_scale, cnn_padding = 1, 0.66, 1
    batch, seq = 2, 16

    key = jax.random.PRNGKey(0)
    kx, k1, k2, k3, k4, k5 = jax.random.split(key, 6)
    x = jax.random.normal(kx, (batch, dim, seq), jnp.float32)
    b1 = 1.0 / (dim * kernel_size) ** 0.5
    w1 = jax.random.uniform(k1, (bottleneck_dim, dim, kernel_size),
                            jnp.float32, minval=-b1, maxval=b1)
    b2 = 1.0 / bottleneck_dim ** 0.5
    wa = jax.random.uniform(k2, (dim, bottleneck_dim, 1),
                            jnp.float32, minval=-b2, maxval=b2)
    bias = jax.random.uniform(k3, (dim,), jnp.float32, minval=-b2, maxval=b2)
    running_mean = 0.1 * jax.random.normal(k4, (dim,), jnp.float32)
    running_var = jax.random.uniform(k5, (dim,), jnp.float32,
                                     minval=0.5, maxval=1.5)

    out = factorized_tdnn_forward(
        x, w1, wa, bias, running_mean, running_var,
        subsampling_factor=subsampling_factor, bypass_scale=bypass_scale,
        cnn_padding=cnn_padding)
    out = jax.block_until_ready(out)

    ref = _reference_forward(
        x, w1, wa, bias, running_mean, running_var,
        subsampling_factor=subsampling_factor, bypass_scale=bypass_scale,
        cnn_padding=cnn_padding)

    assert out.shape == ref.shape == (batch, dim, seq)
    # bf16 MXU operands vs a pure-f32 XLA reference -> modest tolerance.
    assert jnp.allclose(out, ref, atol=5e-2, rtol=5e-2), \
        float(jnp.max(jnp.abs(out - ref)))
    print("KERNEL_OK")
</pallas_src>

<mosaic_0001>
module attributes {stable_mosaic.version = 11 : i64} {
  func.func @kernel(%arg0: i32, %arg1: i32, %arg2: memref<1x32x128xf32, #tpu.memory_space<vmem>>, %arg3: memref<1x1x32x2xf32, #tpu.memory_space<vmem>>, %arg4: memref<48x32xbf16, #tpu.memory_space<vmem>>, %arg5: memref<32x16xbf16, #tpu.memory_space<vmem>>, %arg6: memref<32x2xf32, #tpu.memory_space<vmem>>, %arg7: memref<1x32x128xf32, #tpu.memory_space<vmem>>) attributes {dimension_semantics = [#tpu.dimension_semantics<parallel>, #tpu.dimension_semantics<parallel>], iteration_bounds = array<i64: 2, 1>, scalar_prefetch = 0 : i64, scratch_operands = 0 : i64, tpu.core_type = #tpu.core_type<tc>, window_params = [{transform_indices = @transform_0, window_bounds = array<i64: 1, 32, 128>}, {transform_indices = @transform_1, window_bounds = array<i64: 1, 1, 32, 2>}, {pipeline_mode = #tpu.pipeline_mode<synchronous>, transform_indices = @transform_2, window_bounds = array<i64: 48, 32>}, {pipeline_mode = #tpu.pipeline_mode<synchronous>, transform_indices = @transform_3, window_bounds = array<i64: 32, 16>}, {pipeline_mode = #tpu.pipeline_mode<synchronous>, transform_indices = @transform_4, window_bounds = array<i64: 32, 2>}, {transform_indices = @transform_5, window_bounds = array<i64: 1, 32, 128>}]} {
    %c128_i32 = arith.constant 128 : i32
    %0 = arith.muli %arg1, %c128_i32 : i32
    %c0 = arith.constant 0 : index
    %c0_0 = arith.constant 0 : index
    %c0_1 = arith.constant 0 : index
    %1 = vector.load %arg2[%c0, %c0_0, %c0_1] : memref<1x32x128xf32, #tpu.memory_space<vmem>>, vector<1x32x128xf32>
    %2 = vector.shape_cast %1 : vector<1x32x128xf32> to vector<32x128xf32>
    %3 = arith.truncf %2 : vector<32x128xf32> to vector<32x128xbf16>
    %c0_2 = arith.constant 0 : index
    %c0_3 = arith.constant 0 : index
    %c0_4 = arith.constant 0 : index
    %c0_5 = arith.constant 0 : index
    %4 = vector.load %arg3[%c0_2, %c0_3, %c0_4, %c0_5] : memref<1x1x32x2xf32, #tpu.memory_space<vmem>>, vector<1x1x32x2xf32>
    %5 = vector.shape_cast %4 : vector<1x1x32x2xf32> to vector<32x2xf32>
    %6 = arith.truncf %5 : vector<32x2xf32> to vector<32x2xbf16>
    %c0_6 = arith.constant 0 : index
    %c0_7 = arith.constant 0 : index
    %7 = vector.load %arg4[%c0_6, %c0_7] : memref<48x32xbf16, #tpu.memory_space<vmem>>, vector<48x32xbf16>
    %cst = arith.constant dense<0.000000e+00> : vector<48x128xf32>
    %8 = tpu.matmul %7, %3, %cst {dimension_numbers = #tpu.dot_dimension_numbers<[1], [0], [0], [1], [0, 0, 1, 1], [], []>} : vector<48x32xbf16>, vector<32x128xbf16>, vector<48x128xf32> -> vector<48x128xf32>
    %c0_8 = arith.constant 0 : index
    %c0_9 = arith.constant 0 : index
    %9 = vector.load %arg4[%c0_8, %c0_9] : memref<48x32xbf16, #tpu.memory_space<vmem>>, vector<48x32xbf16>
    %cst_10 = arith.constant dense<0.000000e+00> : vector<48x2xf32>
    %10 = tpu.matmul %9, %6, %cst_10 {dimension_numbers = #tpu.dot_dimension_numbers<[1], [0], [0], [1], [0, 0, 1, 1], [], []>} : vector<48x32xbf16>, vector<32x2xbf16>, vector<48x2xf32> -> vector<48x2xf32>
    %11 = tpu.iota {dimensions = array<i32: 1>} : vector<1x128xi32>
    %12 = vector.extract_strided_slice %8 {offsets = [0, 0], sizes = [16, 128], strides = [1, 1]} : vector<48x128xf32> to vector<16x128xf32>
    %c1_i32 = arith.constant 1 : i32
    %13 = tpu.dynamic_rotate %12 by %c1_i32 dim 1 : vector<16x128xf32>, i32 -> vector<16x128xf32>
    %c0_i32 = arith.constant 0 : i32
    %14 = vector.broadcast %c0_i32 : i32 to vector<1x128xi32>
    %15 = arith.cmpi eq, %11, %14 : vector<1x128xi32>
    %16 = vector.extract_strided_slice %10 {offsets = [0, 0], sizes = [16, 1], strides = [1, 1]} : vector<48x2xf32> to vector<16x1xf32>
    %17 = vector.shape_cast %15 : vector<1x128xi1> to vector<1x128xi1>
    %18 = vector.broadcast %17 : vector<1x128xi1> to vector<16x128xi1>
    %19 = vector.shape_cast %16 : vector<16x1xf32> to vector<16x1xf32>
    %20 = vector.broadcast %19 : vector<16x1xf32> to vector<16x128xf32>
    %21 = arith.select %18, %20, %13 : vector<16x128xi1>, vector<16x128xf32>
    %22 = vector.extract_strided_slice %8 {offsets = [16, 0], sizes = [16, 128], strides = [1, 1]} : vector<48x128xf32> to vector<16x128xf32>
    %23 = arith.addf %21, %22 : vector<16x128xf32>
    %24 = vector.extract_strided_slice %8 {offsets = [32, 0], sizes = [16, 128], strides = [1, 1]} : vector<48x128xf32> to vector<16x128xf32>
    %c127_i32 = arith.constant 127 : i32
    %25 = tpu.dynamic_rotate %24 by %c127_i32 dim 1 : vector<16x128xf32>, i32 -> vector<16x128xf32>
    %c127_i32_11 = arith.constant 127 : i32
    %26 = vector.broadcast %c127_i32_11 : i32 to vector<1x128xi32>
    %27 = arith.cmpi eq, %11, %26 : vector<1x128xi32>
    %28 = vector.extract_strided_slice %10 {offsets = [32, 1], sizes = [16, 1], strides = [1, 1]} : vector<48x2xf32> to vector<16x1xf32>
    %29 = vector.shape_cast %27 : vector<1x128xi1> to vector<1x128xi1>
    %30 = vector.broadcast %29 : vector<1x128xi1> to vector<16x128xi1>
    %31 = vector.shape_cast %28 : vector<16x1xf32> to vector<16x1xf32>
    %32 = vector.broadcast %31 : vector<16x1xf32> to vector<16x128xf32>
    %33 = arith.select %30, %32, %25 : vector<16x128xi1>, vector<16x128xf32>
    %34 = arith.addf %23, %33 : vector<16x128xf32>
    %35 = vector.broadcast %0 : i32 to vector<1x128xi32>
    %36 = arith.addi %35, %11 : vector<1x128xi32>
    %c1_i32_12 = arith.constant 1 : i32
    %37 = vector.broadcast %c1_i32_12 : i32 to vector<1x128xi32>
    %38 = arith.cmpi sge, %36, %37 : vector<1x128xi32>
    %c15_i32 = arith.constant 15 : i32
    %39 = vector.broadcast %c15_i32 : i32 to vector<1x128xi32>
    %40 = arith.cmpi slt, %36, %39 : vector<1x128xi32>
    %41 = arith.andi %38, %40 : vector<1x128xi1>
    %cst_13 = arith.constant 0.000000e+00 : f32
    %42 = vector.shape_cast %41 : vector<1x128xi1> to vector<1x128xi1>
    %43 = vector.broadcast %42 : vector<1x128xi1> to vector<16x128xi1>
    %44 = vector.broadcast %cst_13 : f32 to vector<16x128xf32>
    %45 = arith.select %43, %34, %44 : vector<16x128xi1>, vector<16x128xf32>
    %c0_14 = arith.constant 0 : index
    %c0_15 = arith.constant 0 : index
    %46 = vector.load %arg5[%c0_14, %c0_15] : memref<32x16xbf16, #tpu.memory_space<vmem>>, vector<32x16xbf16>
    %47 = arith.truncf %45 : vector<16x128xf32> to vector<16x128xbf16>
    %cst_16 = arith.constant dense<0.000000e+00> : vector<32x128xf32>
    %48 = tpu.matmul %46, %47, %cst_16 {dimension_numbers = #tpu.dot_dimension_numbers<[1], [0], [0], [1], [0, 0, 1, 1], [], []>} : vector<32x16xbf16>, vector<16x128xbf16>, vector<32x128xf32> -> vector<32x128xf32>
    %c0_17 = arith.constant 0 : index
    %c0_18 = arith.constant 0 : index
    %49 = vector.load %arg6[%c0_17, %c0_18] : memref<32x2xf32, #tpu.memory_space<vmem>>, vector<32x1xf32>
    %50 = vector.broadcast %49 : vector<32x1xf32> to vector<32x128xf32>
    %51 = arith.addf %48, %50 : vector<32x128xf32>
    %cst_19 = arith.constant 0.000000e+00 : f32
    %52 = vector.broadcast %cst_19 : f32 to vector<32x128xf32>
    %53 = arith.maximumf %51, %52 : vector<32x128xf32>
    %c0_20 = arith.constant 0 : index
    %c1 = arith.constant 1 : index
    %54 = vector.load %arg6[%c0_20, %c1] : memref<32x2xf32, #tpu.memory_space<vmem>>, vector<32x1xf32>
    %55 = vector.broadcast %54 : vector<32x1xf32> to vector<32x128xf32>
    %56 = arith.addf %53, %55 : vector<32x128xf32>
    %cst_21 = arith.constant 6.600000e-01 : f32
    %57 = vector.broadcast %cst_21 : f32 to vector<32x128xf32>
    %58 = arith.mulf %57, %2 : vector<32x128xf32>
    %59 = arith.addf %56, %58 : vector<32x128xf32>
    %c0_22 = arith.constant 0 : index
    %c0_23 = arith.constant 0 : index
    %c0_24 = arith.constant 0 : index
    %60 = vector.load %arg7[%c0_22, %c0_23, %c0_24] : memref<1x32x128xf32, #tpu.memory_space<vmem>>, vector<1x32x128xf32>
    %61 = vector.shape_cast %60 : vector<1x32x128xf32> to vector<32x128xf32>
    %62 = vector.shape_cast %59 : vector<32x128xf32> to vector<1x32x128xf32>
    tpu.vector_store %arg7[%c0_22, %c0_23, %c0_24], %62 {strides = array<i32>} : memref<1x32x128xf32, #tpu.memory_space<vmem>>, vector<1x32x128xf32>,
    return
  }
  func.func @transform_0(%arg0: i32, %arg1: i32) -> (i32, i32, i32) {
    %c0_i32 = arith.constant 0 : i32
    %c0_i32_0 = arith.constant 0 : i32
    return %arg0, %c0_i32, %arg1 : i32, i32, i32
  }
  func.func @transform_1(%arg0: i32, %arg1: i32) -> (i32, i32, i32, i32) {
    %c0_i32 = arith.constant 0 : i32
    %c0_i32_0 = arith.constant 0 : i32
    %c0_i32_1 = arith.constant 0 : i32
    return %arg0, %arg1, %c0_i32, %c0_i32_0 : i32, i32, i32, i32
  }
  func.func @transform_2(%arg0: i32, %arg1: i32) -> (i32, i32) {
    %c0_i32 = arith.constant 0 : i32
    %c0_i32_0 = arith.constant 0 : i32
    %c0_i32_1 = arith.constant 0 : i32
    return %c0_i32, %c0_i32_0 : i32, i32
  }
  func.func @transform_3(%arg0: i32, %arg1: i32) -> (i32, i32) {
    %c0_i32 = arith.constant 0 : i32
    %c0_i32_0 = arith.constant 0 : i32
    %c0_i32_1 = arith.constant 0 : i32
    return %c0_i32, %c0_i32_0 : i32, i32
  }
  func.func @transform_4(%arg0: i32, %arg1: i32) -> (i32, i32) {
    %c0_i32 = arith.constant 0 : i32
    %c0_i32_0 = arith.constant 0 : i32
    %c0_i32_1 = arith.constant 0 : i32
    return %c0_i32, %c0_i32_0 : i32, i32
  }
  func.func @transform_5(%arg0: i32, %arg1: i32) -> (i32, i32, i32) {
    %c0_i32 = arith.constant 0 : i32
    %c0_i32_0 = arith.constant 0 : i32
    return %arg0, %c0_i32, %arg1 : i32, i32, i32
  }
}

</mosaic_0001>

<bundles_post_ra>
// kernel: tpu_custom_call.1
= control target key start
LH: loop header
LB: loop body
LE: loop exit
PB: predicated region body
PF: predicated region fallthrough
CT: control target
= control target key end

     0   :  { %10 = vsyncpa [#allocation3], 0  ;;  %s1189_s0 = inlined_call_operand.vmem [shape: f32[2,32,128], index: 0, kind: input, shape index: {}]   ;;  %s1190_s1 = inlined_call_operand.vmem [shape: f32[2,1,32,2], index: 1, kind: input, shape index: {}]   ;;  %s1191_s2 = inlined_call_operand.vmem [shape: bf16[48,32], index: 2, kind: input, shape index: {}]   ;;  %s1192_s3 = inlined_call_operand.vmem [shape: bf16[32,16], index: 3, kind: input, shape index: {}]   ;;  %s1193_s4 = inlined_call_operand.vmem [shape: f32[32,2], index: 4, kind: input, shape index: {}]   ;;  %s1194_s5 = inlined_call_operand.hbm [shape: f32[2,32,128], index: 5, kind: output, shape index: {}]  }
   0x1   :  { %12 = vsyncpa [#allocation3 + $0x1], 0  ;;  %s1014_s18 = smov 0   ;;  %s1016_s19 = smov 0  }
   0x2   :  { %s1018_s20 = smov 0   ;;  %s1020_s21 = smov 0  }
   0x3   :  { %s1022_s22 = smov 0   ;;  %s1024_s23 = smov 0  }
   0x4 LB: > { %s737_s24 = sadd.s32 4294967295, %s973_s23   ;;  %s738_s25 = sadd.s32 4294967294, %s973_s23   ;;  %s973_s23 = sphi %s1024_s23, %s18_s23   ;;  %s969_s22 = sphi %s1022_s22, %s1201_s22   ;;  %s965_s21 = sphi %s1020_s21, %s1200_s21   ;;  %s961_s20 = sphi %s1018_s20, %s1199_s20   ;;  %s957_s19 = sphi %s1016_s19, %s1198_s19   ;;  %s953_s18 = sphi %s1014_s18, %s1197_s18  }
   0x5   : > { %s30_s26 = sadd.s32 1, %s969_s22  ;;  %s158_s27 = sadd.s32 1, %s961_s20 }
   0x6   : > { %p32_p0 = scmp.ge.s32.totalorder %s30_s26, 2  ;;  %p168_p1 = scmp.ne.s32.totalorder %s961_s20, %s957_s19 }
   0x7   : > { %p169_p2 = scmp.eq.s32.totalorder %s737_s24, 1  ;;  %p174_p3 = scmp.ne.s32.totalorder %s957_s19, %s953_s18 }
   0x8   : > { %s1203_s26 = smov (%p32_p0, %s30_s26), 0  ;;  %p175_p5 = scmp.eq.s32.totalorder %s738_s25, 1 }
   0x9   : > { %p1054_p4 = por %p169_p2, %p168_p1  ;;  %s153_s29 = ssub.s32 %s969_s22, %s1203_s26 }
   0xa   : > { %p741_p6 = scmp.ge.s32.totalorder %s973_s23, 1  ;;  %p156_p7 = scmp.eq.s32.totalorder %s153_s29, 0 }
   0xb   : > { %p1061_p8 = por %p175_p5, %p174_p3  ;;  %p225_p9 = scmp.lt.s32.totalorder %s973_s23, 3 }
   0xc   : > { %s1067_s6 = scalar_select %p156_p7, %s961_s20, %s158_s27  }
   0xd   : > { %p226_p10 = pnand %p741_p6, %p225_p9 }
   0xe   : > { %p265_p11 = scmp.lt.s32.totalorder (!%p226_p10), %s965_s21, 1  ;;  %v975_v0 = vmov (!%p226_p10), 0.0   ;;  %vm976_vm0 = vmmov (!%p226_p10), 0   ;;  %v977_v1 = vmov (!%p226_p10), 0   ;;  %v890_v14 = vld [vmem:[%s1191_s2] sm:$0xff] (!%p226_p10)   ;;  %vm317_vm1 = vcmask (!%p226_p10), 261120  }
   0xf   : > { %229 = sbr.rel (%p226_p10) target bundleno = 652 (0x28c), region = 40  ;;  %784 = vmatprep.subr.bf16.mxu0 (!%p226_p10), %v975_v0  ;;  %800 = vmatprep.subr.bf16.mxu1 (!%p226_p10), %v975_v0  ;;  %v891_v15 = vld [vmem:[%s1191_s2 + $0x8] sm:$0xff] (!%p226_p10)   ;;  %v892_v16 = vld [vmem:[%s1191_s2 + $0x10] sm:$0xff] (!%p226_p10)   ;;  %v978_v17 = vmov (!%p226_p10), 1   ;;  %s979_s29 = smov (!%p226_p10), 1   ;;  %v497_v38 = vld [vmem:[%s1193_s4] sm:$0xff] (!%p226_p10)  ;;  %v439_v49 = vlaneseq (!%p226_p10) }
  0x10   : > { %788 = vmatprep.mubr.msk.bf16.mxu0 (!%p226_p10), %vm976_vm0, %v975_v0  ;;  %804 = vmatprep.mubr.msk.bf16.mxu1 (!%p226_p10), %vm976_vm0, %v975_v0  ;;  %v499_v43 = vld [vmem:[%s1193_s4 + $0x10] sm:$0xff] (!%p226_p10)  ;;  %v893_v44 = vld [vmem:[%s1192_s3] sm:$0xff] (!%p226_p10)   ;;  %vm531_vm2 = vcmask (!%p226_p10), 130048   ;;  %v498_v45 = vld [vmem:[%s1193_s4 + $0x8] sm:$0xff] (!%p226_p10)  ;;  %s262_s27 = sand.u32 (!%p226_p10), 1, %s957_s19   ;;  %s770_s9 = sshll.u32 (!%p226_p10), %s965_s21, 9 }
  0x11   : > { %885 = vset.pattern.permute.xlu0 (!%p226_p10), %v977_v1  ;;  %886 = vset.pattern.permute.xlu1 (!%p226_p10), %v978_v17  ;;  %v500_v46 = vld [vmem:[%s1193_s4 + $0x18] sm:$0xff] (!%p226_p10)  ;;  %v440_v51 = vand.u32 (!%p226_p10), 127, %v439_v49  ;;  %s1139_s12 = scalar_lea.hbm (!%p226_p10), %s1194_s5, %s770_s9 }
  0x13   : > { %vm445_vm3 = vcmp.eq.s32.totalorder (!%p226_p10), %v440_v51, 0  ;;  %vm466_vm4 = vcmp.eq.s32.totalorder (!%p226_p10), %v440_v51, 127  ;;  %vm485_vm5 = vcmp.ge.s32.totalorder (!%p226_p10), %v440_v51, 1  ;;  %vm486_vm6 = vcmp.lt.s32.totalorder (!%p226_p10), %v440_v51, 15 }
  0x14   : > { %vm487_vm7 = vmand (!%p226_p10), %vm485_vm5, %vm486_vm6 }
  0x15   : > { %vm758_vm8 = vmpackc.low (!%p226_p10), %vm487_vm7, %vm487_vm7 }
  0x16   : > { %s266_s7 = scalar_select %p265_p11, %s965_s21, 1 }
  0x17   : > { %s1143_s21 = scalar_lea.sflag [#allocation3], %s262_s27 }
  0x18   : > { %s768_s8 = sshll.u32 %s266_s7, 5  ;;  %s980_s7 = smov 127  }
  0x19   : > { %s272_s11 = scalar_lea.vmem %s1189_s0, %s768_s8  ;;  %s281_s14 = scalar_lea.vmem %s1190_s1, %s768_s8 }
  0x1a   : > { %v1080_v2 = vld [vmem:[%s272_s11] sm:$0xff]  ;;  %v1082_v3 = vld [vmem:[%s272_s11 + $0x8] sm:$0xff]  ;;  %v1086_v7 = vld [vmem:[%s272_s11 + $0x10] sm:$0xff] }
  0x1b   : > { %v290_v4 = vld [vmem:[%s281_s14] sm:$0xff]  ;;  %v288_v5 = vpack.c.bf16 %v1082_v3, %v1080_v2  ;;  %v291_v6 = vld [vmem:[%s281_s14 + $0x8] sm:$0xff]  ;;  %v1088_v9 = vld [vmem:[%s272_s11 + $0x18] sm:$0xff] }
  0x1c   : > { %v294_v8 = vpack.c.bf16 %v291_v6, %v290_v4  ;;  %v292_v10 = vld [vmem:[%s281_s14 + $0x10] sm:$0xff]  ;;  %v293_v11 = vld [vmem:[%s281_s14 + $0x18] sm:$0xff]  ;;  %v289_v12 = vpack.c.bf16 %v1088_v9, %v1086_v7  ;;  %v894_v4 = vld [vmem:[%s1192_s3 + $0x8] sm:$0xff]   ;;  %s981_s14 = smov [#allocation2]  }
  0x1d   : > { %785 = vmatpush3.bf16.msra.mxu0 %v288_v5  ;;  %v295_v13 = vpack.c.bf16 %v293_v11, %v292_v10  ;;  %s899_s15 = sshll.u32 %s981_s14, 4  ;;  %s900_s15 = int_to_ptr.vmem [resolvable:$false] %s899_s15 }
  0x1e   : > { %801 = vmatpush3.bf16.msra.mxu1 %v294_v8  ;;  %786 = vmatprep.subr.bf16.mxu0 %v975_v0  ;;  %s901_s16 = scalar_lea.vmem %s900_s15, 1024 }
  0x1f   : > { %802 = vmatprep.subr.bf16.mxu1 %v975_v0 }
  0x21   : > { %787 = vmatpush3.bf16.msra.mxu0 %v289_v12 }
  0x22   : > { %803 = vmatpush3.bf16.msra.mxu1 %v295_v13 }
  0x24   : > { %789 = vmatmul.mubr.msk.bf16.vlgmr.msra.gmra.mrb[0].mxu0 %vm317_vm1, %v890_v14 }
  0x25   : > { %805 = vmatmul.mubr.msk.bf16.vlgmr.msra.gmra.mrb[0].mxu1 %vm317_vm1, %v890_v14  ;;  %792 = vmatprep.mubr.msk.bf16.mxu0 %vm976_vm0, %v975_v0 }
  0x26   : > { %808 = vmatprep.mubr.msk.bf16.mxu1 %vm976_vm0, %v975_v0 }
  0x2c   : > { %793 = vmatmul.mubr.msk.bf16.gmra.mrb[4].mxu0 %vm317_vm1, %v891_v15 }
  0x2d   : > { %809 = vmatmul.mubr.msk.bf16.gmra.mrb[4].mxu1 %vm317_vm1, %v891_v15  ;;  %796 = vmatprep.mubr.msk.bf16.mxu0 %vm976_vm0, %v975_v0 }
  0x2e   : > { %812 = vmatprep.mubr.msk.bf16.mxu1 %vm976_vm0, %v975_v0 }
  0x34   : > { %797 = vmatmul.mubr.msk.bf16.gmra.mrb[8].mxu0 %vm317_vm1, %v892_v16 }
  0x35   : > { %813 = vmatmul.mubr.msk.bf16.gmra.mrb[8].mxu1 %vm317_vm1, %v892_v16  ;;  %818 = vmatprep.mubr.msk.bf16.mxu0 %vm531_vm2, %v893_v44 }
  0xf7   : > { %v361_v18 = vpop.f32.mrb[0].mxu0 }
  0xf8   : > { %v418_v19 = vpop.f32.mrb[0].mxu1  ;;  %v790_v20 = vpop.f32.mrb[1].mxu0 }
  0xf9   : > { %450 = vperm.xlu0 %885, %v418_v19   ;;  %v806_v21 = vpop.f32.mrb[1].mxu1  ;;  %v364_v22 = vpop.f32.mrb[2].mxu0  ;;  %v613_v20 = vmul.f32 0.66, %v1086_v7 }
  0xfa   : > { %v421_v23 = vpop.f32.mrb[2].mxu1  ;;  %v791_v24 = vpop.f32.mrb[3].mxu0 }
  0xfb   : > { %v807_v25 = vpop.f32.mrb[3].mxu1 }
  0xfd   : > { %455 = vperm.xlu0 %885, %v421_v23   ;;  %v611_v23 = vmul.f32 0.66, %v1080_v2 }
  0xff   : > { %v369_v26 = vpop.f32.mrb[4].mxu0 }
 0x100   : > { %v426_v27 = vpop.f32.mrb[4].mxu1  ;;  %v794_v28 = vpop.f32.mrb[5].mxu0 }
 0x101   : > { %v810_v29 = vpop.f32.mrb[5].mxu1  ;;  %441 = vrot.lane.b32.xlu0 %v361_v18, %s979_s29  ;;  %v372_v30 = vpop.f32.mrb[6].mxu0  ;;  %v614_v28 = vmul.f32 0.66, %v1088_v9 }
 0x102   : > { %v428_v31 = vpop.f32.mrb[6].mxu1  ;;  %v795_v32 = vpop.f32.mrb[7].mxu0  ;;  %v612_v29 = vmul.f32 0.66, %v1082_v3 }
 0x103   : > { %v811_v33 = vpop.f32.mrb[7].mxu1 }
 0x107   : > { %v377_v34 = vpop.f32.mrb[8].mxu0 }
 0x108   : > { %v432_v35 = vpop.f32.mrb[8].mxu1  ;;  %462 = vrot.lane.b32.xlu0 %v377_v34, %s980_s7  ;;  %v798_v36 = vpop.f32.mrb[9].mxu0 }
 0x109   : > { %471 = vperm.xlu1 %886, %v432_v35   ;;  %v814_v37 = vpop.f32.mrb[9].mxu1  ;;  %v380_v39 = vpop.f32.mrb[10].mxu0 }
 0x10a   : > { %v435_v40 = vpop.f32.mrb[10].mxu1  ;;  %v799_v41 = vpop.f32.mrb[11].mxu0 }
 0x10b   : > { %v815_v42 = vpop.f32.mrb[11].mxu1 }
 0x10c   : > { %503 = vperm.xlu0 %885, %v497_v38  }
 0x10d   : > { %476 = vperm.xlu1 %886, %v435_v40  }
 0x110   : > { %513 = vperm.xlu0 %885, %v499_v43  }
 0x111   : > { %443 = vrot.lane.b32.xlu1 %v364_v22, %s979_s29  ;;  %s742_s29 = sshll.u32 %s262_s27, 5 }
 0x112   : > { %887 = vset.pattern.permute.xlu1 %v977_v1 }
 0x114   : > { %888 = vset.pattern.permute.xlu0 %v978_v17 }
 0x115   : > { %464 = vrot.lane.b32.xlu1 %v380_v39, %s980_s7  ;;  %592 = vperm.xlu0 %888, %v497_v38   ;;  %s264_s7 = scalar_lea.vmem [#allocation2], %s742_s29 }
 0x116   : > { %s638_s8 = sshll.u32 %s264_s7, 4  ;;  %s1134_s8 = int_to_ptr.vmem [resolvable:$true] %s638_s8 }
 0x117   : > { %s895_s13 = scalar_lea.vmem %s1134_s8, 512  ;;  %p902_p1 = scmp.lt.s32.totalorder %s1134_s8, %s900_s15 }
 0x118   : > { %p896_p12 = scmp.ne.s32.totalorder %s1134_s8, %s895_s13  ;;  %p903_p2 = scmp.lt.s32.totalorder %s901_s16, %s895_s13 }
 0x119   : > { %508 = vperm.xlu1 %887, %v498_v45   ;;  %604 = vperm.xlu0 %888, %v500_v46  }
 0x11a   : > { %p897_p13 = pnand %p896_p12, %p1054_p4  ;;  %p904_p3 = por %p903_p2, %p902_p1 }
 0x11c   : > { %p898_p0 = pneg %p897_p13 }
 0x11d   : > { %518 = vperm.xlu1 %887, %v500_v46  }
 0x11e   : > { %p905_p5 = pnand %p904_p3, %p898_p0 }
 0x121   : > { %889 = vset.pattern.permute.xlu1 %v978_v17 }
 0x122   : > { %596 = vperm.xlu1 %889, %v498_v45  }
 0x126   : > { %600 = vperm.xlu1 %889, %v499_v43  }
 0x178   : > { %v451_v47 = vpop.permute.xlu0 %450 }
 0x17c   : > { %v456_v48 = vpop.permute.xlu0 %455 }
 0x180   : > { %v442_v52 = vpop.permute.xlu0 %441 }
 0x181   : > { %v458_v56 = vsel %vm445_vm3, %v451_v47, %v442_v52 }
 0x182   : > { %v460_v59 = vadd.f32 %v458_v56, %v369_v26 }
 0x184   : > { %v463_v54 = vpop.permute.xlu0 %462 }
 0x188   : > { %v472_v50 = vpop.permute.xlu1 %471 }
 0x189   : > { %v479_v58 = vsel %vm466_vm4, %v472_v50, %v463_v54 }
 0x18a   : > { %v481_v63 = vadd.f32 %v479_v58, %v460_v59 }
 0x18b   : > { %v504_v6 = vpop.permute.xlu0 %503 }
 0x18c   : > { %v477_v53 = vpop.permute.xlu1 %476 }
 0x18f   : > { %v514_v10 = vpop.permute.xlu0 %513 }
 0x190   : > { %v444_v55 = vpop.permute.xlu1 %443 }
 0x191   : > { %v459_v57 = vsel %vm445_vm3, %v456_v48, %v444_v55 }
 0x192   : > { %v461_v60 = vadd.f32 %v459_v57, %v372_v30 }
 0x194   : > { %v465_v61 = vpop.permute.xlu1 %464  ;;  %v593_v13 = vpop.permute.xlu0 %592 }
 0x195   : > { %v480_v62 = vsel %vm466_vm4, %v477_v53, %v465_v61 }
 0x196   : > { %v482_v0 = vadd.f32 %v480_v62, %v461_v60 }
 0x198   : > { %v759_v1 = vpack.c.bf16 %v482_v0, %v481_v63  ;;  %v509_v5 = vpop.permute.xlu1 %508  ;;  %v605_v32 = vpop.permute.xlu0 %604 }
 0x19a   : > { %816 = vmatprep.subr.msk.bf16.mxu0 %vm758_vm8, %v759_v1 }
 0x19b   : > { %817 = vmatpush3.bf16.msk.msra.mxu0 %vm758_vm8, %v759_v1 }
 0x19c   : > { %v519_v8 = vpop.permute.xlu1 %518 }
 0x19e   : > { %819 = vmatmul.mubr.msk.bf16.vlgmr.msra.gmra.mrb[12].mxu0 %vm531_vm2, %v894_v4 }
 0x1a1   : > { %v597_v11 = vpop.permute.xlu1 %596 }
 0x1a5   : > { %v601_v17 = vpop.permute.xlu1 %600 }
 0x271   : > { %v820_v12 = vpop.f32.mrb[12].mxu0 }
 0x272   : > { %v581_v14 = vadd.f32 %v820_v12, %v514_v10  ;;  %v572_v15 = vpop.f32.mrb[13].mxu0 }
 0x273   : > { %v573_v16 = vadd.f32 %v572_v15, %v504_v6  ;;  %v821_v18 = vpop.f32.mrb[14].mxu0 }
 0x274   : > { %v589_v19 = vmax.f32 %v581_v14, 0.0  ;;  %v584_v21 = vadd.f32 %v821_v18, %v519_v8  ;;  %v575_v22 = vpop.f32.mrb[15].mxu0 }
 0x275   : > { %v587_v24 = vmax.f32 %v573_v16, 0.0  ;;  %v576_v25 = vadd.f32 %v575_v22, %v509_v5 }
 0x276   : > { %v609_v26 = vadd.f32 %v601_v17, %v589_v19  ;;  %v590_v27 = vmax.f32 %v584_v21, 0.0 }
 0x277   : > { %v607_v30 = vadd.f32 %v593_v13, %v587_v24  ;;  %v588_v31 = vmax.f32 %v576_v25, 0.0 }
 0x278   : > { %v617_v7 = vadd.f32 %v613_v20, %v609_v26  ;;  %v610_v33 = vadd.f32 %v605_v32, %v590_v27 }
 0x279   : > { %v615_v34 = vadd.f32 %v611_v23, %v607_v30  ;;  %v608_v2 = vadd.f32 %v597_v11, %v588_v31 }
 0x27a   : > { %621 = vst [vmem:[%s264_s7 + $0x10] sm:$0xff] %v617_v7  ;;  %v618_v9 = vadd.f32 %v614_v28, %v610_v33 }
 0x27b   : > { %619 = vst [vmem:[%s264_s7] sm:$0xff] %v615_v34  ;;  %v616_v3 = vadd.f32 %v612_v29, %v608_v2 }
 0x27c   : > { %622 = vst [vmem:[%s264_s7 + $0x18] sm:$0xff] %v618_v9 }
 0x27d   : > { %620 = vst [vmem:[%s264_s7 + $0x8] sm:$0xff] %v616_v3 }
 0x27e   : > { %908 = shalt.err (!%p905_p5)
}
 0x27f   : > { %s909_s17 = scalar_lea.hbm %s1139_s12, 512  ;;  %s913_s27 = scalar_lea.hbm %s1194_s5, 1024 }
 0x280   : > { %p910_p6 = scmp.ne.s32.totalorder %s1139_s12, %s909_s17  ;;  %p914_p10 = scmp.lt.u32.totalorder %s1139_s12, %s1194_s5 }
 0x281   : > { %p915_p11 = scmp.lt.u32.totalorder %s913_s27, %s909_s17  ;;  %p917_p13 = scmp.lt.u32.totalorder %s909_s17, %s1139_s12 }
 0x282   : > { %p911_p7 = pnand %p910_p6, %p1054_p4 }
 0x283   : > { %p916_p12 = por %p915_p11, %p914_p10 }
 0x284   : > { %p912_p9 = pneg %p911_p7 }
 0x285   : > { %p918_p0 = por %p917_p13, %p916_p12 }
 0x287   : > { %p919_p1 = pnand %p918_p0, %p912_p9 }
 0x289   : > { %922 = shalt.err (!%p919_p1)
}
 0x28a   : > { %s982_s9 = smov 128   ;;  %s983_s10 = smov 8  }
 0x28b   : > { %822 = dma.vmem_to_hbm [thread:$0]  (%p1054_p4), %s1134_s8, 512, %s1139_s12, %s1143_s21, %s982_s9, %s982_s9, %s983_s10  }
 0x28c PF: > { %p828_p2 = scmp.ge.s32.totalorder %s973_s23, 2  ;;  %s653_s11 = sand.u32 1, %s953_s18  }
 0x28d   : > { %s654_s13 = scalar_lea.sflag [#allocation3], %s653_s11 }
 0x28e   : > { %p825_p3 = pnand %p828_p2, %p1061_p8 }
 0x290   : > { %948 = dma.done.wait (!%p825_p3), %s654_s13, 512  }
 0x291   : > { %950 = vsyncadd (!%p825_p3), %s654_s13, 4294966784  ;;  %s18_s23 = sadd.s32 1, %s973_s23   ;;  %s1197_s18 = smov %s957_s19 }
 0x292   : > { %p15_p5 = scmp.ge.s32.totalorder %s18_s23, 4   ;;  %s1198_s19 = smov %s961_s20 }
 0x293   : > { %s1199_s20 = smov %s1067_s6  ;;  %s1200_s21 = smov %s969_s22 }
 0x294   : > { %s1201_s22 = smov %s1203_s26  ;;  %17 = sbr.rel (!%p15_p5) target bundleno = 4 (0x4), region = 78 }
 0x29b   :  { %659 = vsyncpa [#allocation3], 1 }
 0x29c   :  { %661 = vsyncpa [#allocation3 + $0x1], 1 }

</bundles_post_ra>
